<compile_context>
chip_gen: v6e
topology: v6e:2x2x1
jax: 0.10.0
libtpu: 0.0.40
codegen_flags: <defaults>
</compile_context>

<pallas_src>
import jax
import jax.numpy as jnp
from jax.experimental import pallas as pl
from jax.experimental.pallas import tpu as pltpu


def _make_combine_kernel(num_models):
    """Kernel over refs: (x_0..x_{M-1}, w_0..w_{M-1}, b, o).

    x_m: (TM, K) f32    w_m: (K, C) f32 (pre-transposed, VMEM-resident)
    b  : (1, C)  f32    o  : (TM, C) f32
    """

    def kernel(*refs):
        x_refs = refs[:num_models]
        w_refs = refs[num_models:2 * num_models]
        b_ref = refs[2 * num_models]
        o_ref = refs[2 * num_models + 1]

        # Per-model partial products in natural (M,K)x(K,N) MXU orientation,
        # f32 accumulation.  (A single K=M*K dot via in-kernel lane-concat of
        # the x tiles is a possible cleanup, but this kernel is HBM-bound.)
        acc = jnp.dot(x_refs[0][...], w_refs[0][...],
                      preferred_element_type=jnp.float32)
        for m in range(1, num_models):
            acc = acc + jnp.dot(x_refs[m][...], w_refs[m][...],
                                preferred_element_type=jnp.float32)

        o_ref[...] = (acc + b_ref[...]).astype(o_ref.dtype)

    return kernel


def _choose_tm(B, block_m):
    """Batch tile: large (amortize per-step overhead), sublane-aligned (mult.
    of 8 or the full extent), and >=2 grid steps when B > 8 so the 'parallel'
    batch axis can shard across both TensorCores on v7x."""
    if B <= 8:
        return B                                   # single full-extent block
    half = (((B + 1) // 2) + 7) // 8 * 8           # ~B/2 rounded up to 8
    return max(8, min(block_m, half))


def simple_combination_forward(model_outputs, weight, bias, *, block_m=1024):
    """model_outputs: list of num_models arrays, each (B, num_classes), f32.
    weight: (num_classes, num_models*num_classes)  (native PyTorch Linear layout)
    bias:   (num_classes,)
    Returns f32 (B, num_classes).  Dropout(0.1) in eval mode == identity.
    """
    num_models = len(model_outputs)
    B, K = model_outputs[0].shape
    C, F = weight.shape
    assert F == num_models * K and C == K, "weight shape inconsistent with inputs"

    out_dtype = jnp.float32

    # Wrapper-side weight prep (tiny, one-time): transpose to (F, C) and split
    # into per-model (K, C) tiles so the kernel never slices / reorients it.
    w_t = jnp.asarray(weight, jnp.float32).T            # (F, C)
    w_tiles = [w_t[m * K:(m + 1) * K, :] for m in range(num_models)]
    b2d = jnp.asarray(bias, jnp.float32).reshape(1, C)

    xs = [jnp.asarray(x, jnp.float32) for x in model_outputs]

    tm = _choose_tm(B, block_m)
    grid = (pl.cdiv(B, tm),)

    x_spec = pl.BlockSpec((tm, K), lambda i: (i, 0))
    w_spec = pl.BlockSpec((K, C), lambda i: (0, 0))     # VMEM-resident across grid
    b_spec = pl.BlockSpec((1, C), lambda i: (0, 0))     # VMEM-resident across grid
    o_spec = pl.BlockSpec((tm, C), lambda i: (i, 0))

    f32_bytes = 4
    cost = pl.CostEstimate(
        flops=2 * B * F * C,
        transcendentals=0,
        bytes_accessed=(B * F * f32_bytes           # ensemble logits (read once)
                        + F * C * f32_bytes         # weight
                        + B * C * f32_bytes         # output
                        + C * f32_bytes))           # bias

    kernel = _make_combine_kernel(num_models)

    return pl.pallas_call(
        kernel,
        out_shape=jax.ShapeDtypeStruct((B, C), out_dtype),
        grid_spec=pltpu.PrefetchScalarGridSpec(
            num_scalar_prefetch=0,
            grid=grid,
            in_specs=[x_spec] * num_models + [w_spec] * num_models + [b_spec],
            out_specs=o_spec,
        ),
        compiler_params=pltpu.CompilerParams(
            dimension_semantics=("parallel",)),
        cost_estimate=cost,
    )(*xs, *w_tiles, b2d)


if __name__ == "__main__":
    # Small, TPU-friendly shapes implied by the module.
    batch = 16
    num_models = 4
    num_classes = 32
    in_features = num_models * num_classes  # 128

    key = jax.random.PRNGKey(0)
    k_w, k_b, *k_outs = jax.random.split(key, 2 + num_models)

    # PyTorch-Linear-style init: U(-1/sqrt(fan_in), 1/sqrt(fan_in)).
    bound = 1.0 / (in_features ** 0.5)
    weight = jax.random.uniform(k_w, (num_classes, in_features),
                                minval=-bound, maxval=bound, dtype=jnp.float32)
    bias = jax.random.uniform(k_b, (num_classes,),
                              minval=-bound, maxval=bound, dtype=jnp.float32)

    # Synthetic per-model logits: list of (B, num_classes).
    model_outputs = [
        jax.random.normal(k, (batch, num_classes), dtype=jnp.float32)
        for k in k_outs
    ]

    out = simple_combination_forward(model_outputs, weight, bias)
    out = jax.block_until_ready(out)

    # Reference (eval-mode dropout == identity), full f32.
    x_f32 = jnp.concatenate(model_outputs, axis=1)
    ref_f32 = x_f32 @ weight.T + bias

    assert out.shape == (batch, num_classes)
    assert out.dtype == jnp.float32
    assert jnp.allclose(out, ref_f32, atol=2e-2, rtol=2e-2)

    print("KERNEL_OK")
</pallas_src>

<mosaic_0001>
module attributes {stable_mosaic.version = 11 : i64} {
  func.func @kernel(%arg0: i32, %arg1: memref<8x32xf32, #tpu.memory_space<vmem>>, %arg2: memref<8x32xf32, #tpu.memory_space<vmem>>, %arg3: memref<8x32xf32, #tpu.memory_space<vmem>>, %arg4: memref<8x32xf32, #tpu.memory_space<vmem>>, %arg5: memref<32x32xf32, #tpu.memory_space<vmem>>, %arg6: memref<32x32xf32, #tpu.memory_space<vmem>>, %arg7: memref<32x32xf32, #tpu.memory_space<vmem>>, %arg8: memref<32x32xf32, #tpu.memory_space<vmem>>, %arg9: memref<1x32xf32, #tpu.memory_space<vmem>>, %arg10: memref<8x32xf32, #tpu.memory_space<vmem>>) attributes {dimension_semantics = [#tpu.dimension_semantics<parallel>], iteration_bounds = array<i64: 2>, scalar_prefetch = 0 : i64, scratch_operands = 0 : i64, tpu.core_type = #tpu.core_type<tc>, window_params = [{transform_indices = @transform_0, window_bounds = array<i64: 8, 32>}, {transform_indices = @transform_1, window_bounds = array<i64: 8, 32>}, {transform_indices = @transform_2, window_bounds = array<i64: 8, 32>}, {transform_indices = @transform_3, window_bounds = array<i64: 8, 32>}, {pipeline_mode = #tpu.pipeline_mode<synchronous>, transform_indices = @transform_4, window_bounds = array<i64: 32, 32>}, {pipeline_mode = #tpu.pipeline_mode<synchronous>, transform_indices = @transform_5, window_bounds = array<i64: 32, 32>}, {pipeline_mode = #tpu.pipeline_mode<synchronous>, transform_indices = @transform_6, window_bounds = array<i64: 32, 32>}, {pipeline_mode = #tpu.pipeline_mode<synchronous>, transform_indices = @transform_7, window_bounds = array<i64: 32, 32>}, {pipeline_mode = #tpu.pipeline_mode<synchronous>, transform_indices = @transform_8, window_bounds = array<i64: 1, 32>}, {transform_indices = @transform_9, window_bounds = array<i64: 8, 32>}]} {
    %c0 = arith.constant 0 : index
    %c0_0 = arith.constant 0 : index
    %0 = vector.load %arg1[%c0, %c0_0] : memref<8x32xf32, #tpu.memory_space<vmem>>, vector<8x32xf32>
    %c0_1 = arith.constant 0 : index
    %c0_2 = arith.constant 0 : index
    %1 = vector.load %arg5[%c0_1, %c0_2] : memref<32x32xf32, #tpu.memory_space<vmem>>, vector<32x32xf32>
    %cst = arith.constant dense<0.000000e+00> : vector<8x32xf32>
    %2 = tpu.matmul %0, %1, %cst {dimension_numbers = #tpu.dot_dimension_numbers<[1], [0], [0], [1], [0, 0, 1, 1], [], []>} : vector<8x32xf32>, vector<32x32xf32>, vector<8x32xf32> -> vector<8x32xf32>
    %c0_3 = arith.constant 0 : index
    %c0_4 = arith.constant 0 : index
    %3 = vector.load %arg2[%c0_3, %c0_4] : memref<8x32xf32, #tpu.memory_space<vmem>>, vector<8x32xf32>
    %c0_5 = arith.constant 0 : index
    %c0_6 = arith.constant 0 : index
    %4 = vector.load %arg6[%c0_5, %c0_6] : memref<32x32xf32, #tpu.memory_space<vmem>>, vector<32x32xf32>
    %cst_7 = arith.constant dense<0.000000e+00> : vector<8x32xf32>
    %5 = tpu.matmul %3, %4, %cst_7 {dimension_numbers = #tpu.dot_dimension_numbers<[1], [0], [0], [1], [0, 0, 1, 1], [], []>} : vector<8x32xf32>, vector<32x32xf32>, vector<8x32xf32> -> vector<8x32xf32>
    %6 = arith.addf %2, %5 : vector<8x32xf32>
    %c0_8 = arith.constant 0 : index
    %c0_9 = arith.constant 0 : index
    %7 = vector.load %arg3[%c0_8, %c0_9] : memref<8x32xf32, #tpu.memory_space<vmem>>, vector<8x32xf32>
    %c0_10 = arith.constant 0 : index
    %c0_11 = arith.constant 0 : index
    %8 = vector.load %arg7[%c0_10, %c0_11] : memref<32x32xf32, #tpu.memory_space<vmem>>, vector<32x32xf32>
    %cst_12 = arith.constant dense<0.000000e+00> : vector<8x32xf32>
    %9 = tpu.matmul %7, %8, %cst_12 {dimension_numbers = #tpu.dot_dimension_numbers<[1], [0], [0], [1], [0, 0, 1, 1], [], []>} : vector<8x32xf32>, vector<32x32xf32>, vector<8x32xf32> -> vector<8x32xf32>
    %10 = arith.addf %6, %9 : vector<8x32xf32>
    %c0_13 = arith.constant 0 : index
    %c0_14 = arith.constant 0 : index
    %11 = vector.load %arg4[%c0_13, %c0_14] : memref<8x32xf32, #tpu.memory_space<vmem>>, vector<8x32xf32>
    %c0_15 = arith.constant 0 : index
    %c0_16 = arith.constant 0 : index
    %12 = vector.load %arg8[%c0_15, %c0_16] : memref<32x32xf32, #tpu.memory_space<vmem>>, vector<32x32xf32>
    %cst_17 = arith.constant dense<0.000000e+00> : vector<8x32xf32>
    %13 = tpu.matmul %11, %12, %cst_17 {dimension_numbers = #tpu.dot_dimension_numbers<[1], [0], [0], [1], [0, 0, 1, 1], [], []>} : vector<8x32xf32>, vector<32x32xf32>, vector<8x32xf32> -> vector<8x32xf32>
    %14 = arith.addf %10, %13 : vector<8x32xf32>
    %c0_18 = arith.constant 0 : index
    %c0_19 = arith.constant 0 : index
    %15 = vector.load %arg9[%c0_18, %c0_19] : memref<1x32xf32, #tpu.memory_space<vmem>>, vector<1x32xf32>
    %16 = vector.broadcast %15 : vector<1x32xf32> to vector<8x32xf32>
    %17 = arith.addf %14, %16 : vector<8x32xf32>
    %c0_20 = arith.constant 0 : index
    %c0_21 = arith.constant 0 : index
    %18 = vector.load %arg10[%c0_20, %c0_21] : memref<8x32xf32, #tpu.memory_space<vmem>>, vector<8x32xf32>
    tpu.vector_store %arg10[%c0_20, %c0_21], %17 {strides = array<i32>} : memref<8x32xf32, #tpu.memory_space<vmem>>, vector<8x32xf32>,
    return
  }
  func.func @transform_0(%arg0: i32) -> (i32, i32) {
    %c0_i32 = arith.constant 0 : i32
    %c0_i32_0 = arith.constant 0 : i32
    return %arg0, %c0_i32 : i32, i32
  }
  func.func @transform_1(%arg0: i32) -> (i32, i32) {
    %c0_i32 = arith.constant 0 : i32
    %c0_i32_0 = arith.constant 0 : i32
    return %arg0, %c0_i32 : i32, i32
  }
  func.func @transform_2(%arg0: i32) -> (i32, i32) {
    %c0_i32 = arith.constant 0 : i32
    %c0_i32_0 = arith.constant 0 : i32
    return %arg0, %c0_i32 : i32, i32
  }
  func.func @transform_3(%arg0: i32) -> (i32, i32) {
    %c0_i32 = arith.constant 0 : i32
    %c0_i32_0 = arith.constant 0 : i32
    return %arg0, %c0_i32 : i32, i32
  }
  func.func @transform_4(%arg0: i32) -> (i32, i32) {
    %c0_i32 = arith.constant 0 : i32
    %c0_i32_0 = arith.constant 0 : i32
    %c0_i32_1 = arith.constant 0 : i32
    return %c0_i32, %c0_i32_0 : i32, i32
  }
  func.func @transform_5(%arg0: i32) -> (i32, i32) {
    %c0_i32 = arith.constant 0 : i32
    %c0_i32_0 = arith.constant 0 : i32
    %c0_i32_1 = arith.constant 0 : i32
    return %c0_i32, %c0_i32_0 : i32, i32
  }
  func.func @transform_6(%arg0: i32) -> (i32, i32) {
    %c0_i32 = arith.constant 0 : i32
    %c0_i32_0 = arith.constant 0 : i32
    %c0_i32_1 = arith.constant 0 : i32
    return %c0_i32, %c0_i32_0 : i32, i32
  }
  func.func @transform_7(%arg0: i32) -> (i32, i32) {
    %c0_i32 = arith.constant 0 : i32
    %c0_i32_0 = arith.constant 0 : i32
    %c0_i32_1 = arith.constant 0 : i32
    return %c0_i32, %c0_i32_0 : i32, i32
  }
  func.func @transform_8(%arg0: i32) -> (i32, i32) {
    %c0_i32 = arith.constant 0 : i32
    %c0_i32_0 = arith.constant 0 : i32
    %c0_i32_1 = arith.constant 0 : i32
    return %c0_i32, %c0_i32_0 : i32, i32
  }
  func.func @transform_9(%arg0: i32) -> (i32, i32) {
    %c0_i32 = arith.constant 0 : i32
    %c0_i32_0 = arith.constant 0 : i32
    return %arg0, %c0_i32 : i32, i32
  }
}

</mosaic_0001>

<bundles_post_ra>
// kernel: tpu_custom_call.1
= control target key start
LH: loop header
LB: loop body
LE: loop exit
PB: predicated region body
PF: predicated region fallthrough
CT: control target
= control target key end

     0   :  { %s1928_s0 = inlined_call_operand.hbm [shape: f32[16,32], index: 0, kind: input, shape index: {}]   ;;  %s1929_s1 = inlined_call_operand.hbm [shape: f32[16,32], index: 1, kind: input, shape index: {}]   ;;  %s1930_s2 = inlined_call_operand.hbm [shape: f32[16,32], index: 2, kind: input, shape index: {}]   ;;  %s1931_s3 = inlined_call_operand.hbm [shape: f32[16,32], index: 3, kind: input, shape index: {}]   ;;  %s1932_s4 = inlined_call_operand.hbm [shape: f32[32,32], index: 4, kind: input, shape index: {}]   ;;  %s1933_s5 = inlined_call_operand.hbm [shape: f32[32,32], index: 5, kind: input, shape index: {}]   ;;  %s1934_s6 = inlined_call_operand.hbm [shape: f32[32,32], index: 6, kind: input, shape index: {}]   ;;  %s1935_s7 = inlined_call_operand.hbm [shape: f32[32,32], index: 7, kind: input, shape index: {}]   ;;  %s1936_s8 = inlined_call_operand.vmem [shape: f32[1,32], index: 8, kind: input, shape index: {}]   ;;  %s1937_s9 = inlined_call_operand.hbm [shape: f32[16,32], index: 9, kind: output, shape index: {}]  }
   0x1   :  { %1956 = sst [smem:[#allocation28_spill]] %s1928_s0 }
   0x2   :  { %1957 = sst [smem:[#allocation29_spill]] %s1929_s1 }
   0x3   :  { %1958 = sst [smem:[#allocation30_spill]] %s1932_s4 }
   0x4   :  { %1959 = sst [smem:[#allocation31_spill]] %s1933_s5 }
   0x5   :  { %1960 = sst [smem:[#allocation32_spill]] %s1936_s8 }
   0x6   :  { %1961 = sst [smem:[#allocation33_spill]] %s1937_s9 }
   0x7   :  { %14 = vsyncpa [#allocation3], 0 }
   0x8   :  { %16 = vsyncpa [#allocation3 + $0x1], 0 }
   0x9   :  { %17 = vsyncpa [#allocation6], 0 }
   0xa   :  { %19 = vsyncpa [#allocation6 + $0x1], 0 }
   0xb   :  { %20 = vsyncpa [#allocation9], 0 }
   0xc   :  { %22 = vsyncpa [#allocation9 + $0x1], 0 }
   0xd   :  { %23 = vsyncpa [#allocation12], 0 }
   0xe   :  { %24 = vsyncpa [#allocation15], 0 }
   0xf   :  { %25 = vsyncpa [#allocation4], 0 }
  0x10   :  { %27 = vsyncpa [#allocation4 + $0x1], 0  ;;  %s1595_s30 = smov 0   ;;  %s1597_s10 = smov 0  }
  0x11   :  { %s1599_s11 = smov 0   ;;  %s1601_s12 = smov 0  }
  0x12 LB: > { %1962 = sst [smem:[#allocation24_spill]] %s1518_s30  ;;  %s1616_s13 = sadd.s32 4294967295, %s1530_s12   ;;  %s1530_s12 = sphi %s1601_s12, %s1999_s12   ;;  %s1526_s11 = sphi %s1599_s11, %s2003_s11   ;;  %s1522_s10 = sphi %s1597_s10, %s2002_s10   ;;  %s1518_s30 = sphi %s1595_s30, %s2001_s30  }
  0x13   : > { %s1026_s14 = sadd.s32 4294967294, %s1530_s12   ;;  %p53_p0 = scmp.ne.s32.totalorder %s1522_s10, %s1518_s30 }
  0x14   : > { %p1946_p1 = scmp.eq.s32.totalorder %s1616_s13, 0  ;;  %p260_p2 = scmp.eq.s32.totalorder %s1616_s13, 1 }
  0x15   : > { %p266_p3 = scmp.eq.s32.totalorder %s1026_s14, 1  ;;  %p1027_p5 = scmp.ge.s32.totalorder %s1530_s12, 1 }
  0x16   : > { %p1625_p4 = por %p1946_p1, %p53_p0  ;;  %p273_p7 = scmp.lt.s32.totalorder %s1530_s12, 3 }
  0x17   : > { %p1630_p6 = por %p266_p3, %p53_p0  ;;  %s1532_s18 = smov [#allocation10]  }
  0x18   : > { %s1963_s15 = scalar_select %p1625_p4, 1, 0 }
  0x19   : > { %s1964_s16 = scalar_select %p1630_p6, 1, 0 }
  0x1a   : > { %p1635_p8 = pnand %p1027_p5, %p273_p7  ;;  %s285_s19 = sshll.u32 %s1532_s18, 4  ;;  %s286_s19 = int_to_ptr.vmem [resolvable:$true] %s285_s19 }
  0x1b   : > { %1965 = sst [smem:[#allocation25_spill]] %s1964_s16  ;;  %s1533_s21 = smov [#allocation11]  }
  0x1c   : > { %s1966_s17 = scalar_select %p1635_p8, 1, 0 }
  0x1d   : > { %p1150_p9 = pneg %p1635_p8  ;;  %s298_s22 = sshll.u32 %s1533_s21, 4  ;;  %s299_s22 = int_to_ptr.vmem [resolvable:$true] %s298_s22 }
  0x1e   : > { %s1241_s23 = scalar_lea.vmem %s286_s19, 512  ;;  %p1249_p5 = scmp.lt.s32.totalorder %s286_s19, %s286_s19 }
  0x1f   : > { %p1644_p11 = pnand %p1150_p9, %p1946_p1  ;;  %p1242_p13 = scmp.ne.s32.totalorder %s286_s19, %s1241_s23 }
  0x20   : > { %p1250_p7 = scmp.lt.s32.totalorder %s1241_s23, %s1241_s23 }
  0x21   : > { %s1967_s20 = scalar_select %p1644_p11, 1, 0 }
  0x22   : > { %p1947_p12 = pneg %p1644_p11  ;;  %p1251_p10 = por %p1250_p7, %p1249_p5 }
  0x24   : > { %p1244_p0 = pnand %p1242_p13, %p1947_p12 }
  0x26   : > { %p1245_p3 = pneg %p1244_p0 }
  0x28   : > { %p1252_p9 = pnand %p1251_p10, %p1245_p3 }
  0x2a   : > { %1255 = shalt.err (!%p1252_p9)
}
  0x2b   : > { %s1938_s24 = smov 128   ;;  %s1941_s25 = smov 8  }
  0x2c   : > { %s1968_s4 = sld [smem:[#allocation30_spill]]  ;;  %s1267_s28 = scalar_lea.vmem %s299_s22, 512 }
  0x2d   : > { %p1268_p13 = scmp.ne.s32.totalorder %s299_s22, %s1267_s28  ;;  %p1275_p10 = scmp.lt.s32.totalorder %s299_s22, %s299_s22 }
  0x2e   : > { %p1276_p3 = scmp.lt.s32.totalorder %s1267_s28, %s1267_s28 }
  0x2f   : > { %p1270_p0 = pnand %p1268_p13, %p1947_p12 }
  0x30   : > { %p1277_p7 = por %p1276_p3, %p1275_p10 }
  0x31   : > { %p1271_p5 = pneg %p1270_p0 }
  0x32   : > { %1153 = dma.hbm_to_vmem [thread:$0]  (!%p1644_p11), %s1968_s4, 512, %s286_s19, [#allocation9], %s1938_s24, %s1938_s24, %s1941_s25  }
  0x33   : > { %p1278_p9 = pnand %p1277_p7, %p1271_p5 }
  0x35   : > { %1281 = shalt.err (!%p1278_p9)
}
  0x36   : > { %s1969_s5 = sld [smem:[#allocation31_spill]]  ;;  %s1673_s18 = sadd.s32 1, %s1530_s12  }
  0x37   : > { %1970 = sst [smem:[#allocation26_spill]] %s1673_s18  ;;  %s40_s19 = sadd.s32 1, %s1526_s11 }
  0x38   : > { %s37_s21 = ssub.s32 %s1530_s12, %s1673_s18  ;;  %p47_p13 = scmp.ne.s32.totalorder %s1526_s11, %s1522_s10 }
  0x39   : > { %p38_p0 = scmp.eq.s32.totalorder %s37_s21, 0  ;;  %p48_p5 = scmp.eq.s32.totalorder %s1530_s12, 0 }
  0x3a   : > { %p1683_p10 = por %p260_p2, %p47_p13  ;;  %p1184_p3 = scmp.lt.s32.totalorder %s1530_s12, 2 }
  0x3b   : > { %s1689_s26 = scalar_select %p38_p0, %s1526_s11, %s40_s19  }
  0x3c   : > { %1156 = dma.hbm_to_vmem [thread:$0]  (!%p1644_p11), %s1969_s5, 512, %s299_s22, [#allocation12], %s1938_s24, %s1938_s24, %s1941_s25  }
  0x3d   : > { %s1971_s23 = scalar_select %p1683_p10, 1, 0 }
  0x3e   : > { %1972 = sst [smem:[#allocation27_spill]] %s1689_s26  ;;  %p49_p7 = por %p48_p5, %p47_p13 }
  0x3f   : > { %s1940_s27 = sand.u32 1, %s1526_s11   ;;  %s1697_s28 = sshll.u32 %s1530_s12, 7 }
  0x40   : > { %s1694_s22 = sshll.u32 %s1940_s27, 3  ;;  %p1699_p9 = pnand %p1184_p3, %p49_p7 }
  0x41   : > { %s1948_s14 = sand.u32 1, %s1530_s12   ;;  %s1974_s1 = sld [smem:[#allocation29_spill]] }
  0x42   : > { %s363_s27 = scalar_lea.vmem [#allocation5], %s1694_s22  ;;  %s1713_s4 = scalar_lea.sflag [#allocation6], %s1948_s14 }
  0x43   : > { %s370_s25 = sshll.u32 %s363_s27, 4  ;;  %p1719_p13 = pneg %p1699_p9  ;;  %s371_s25 = int_to_ptr.vmem [resolvable:$true] %s370_s25 }
  0x47   : > { %s1708_s19 = scalar_lea.hbm %s1974_s1, %s1697_s28  ;;  %s1287_s18 = scalar_lea.hbm %s1974_s1, 256 }
  0x48   : > { %s1282_s5 = scalar_lea.hbm %s1708_s19, 128  ;;  %p1288_p3 = scmp.lt.s32.totalorder %s1708_s19, %s1974_s1 }
  0x49   : > { %p1283_p2 = scmp.ne.s32.totalorder %s1708_s19, %s1282_s5  ;;  %p1289_p7 = scmp.lt.s32.totalorder %s1287_s18, %s1282_s5 }
  0x4b   : > { %p1285_p0 = pnand %p1719_p13, %p1283_p2  ;;  %p1290_p1 = por %p1289_p7, %p1288_p3 }
  0x4d   : > { %p1286_p5 = pneg %p1285_p0 }
  0x4f   : > { %p1291_p12 = pnand %p1290_p1, %p1286_p5 }
  0x51   : > { %1294 = shalt.err (!%p1291_p12)
}
  0x52   : > { %s1295_s14 = scalar_lea.vmem %s371_s25, 128  ;;  %s1536_s30 = smov [#allocation5]  }
  0x53   : > { %p1296_p6 = scmp.ne.s32.totalorder %s371_s25, %s1295_s14  ;;  %s1300_s9 = sshll.u32 %s1536_s30, 4  ;;  %s1301_s9 = int_to_ptr.vmem [resolvable:$false] %s1300_s9 }
  0x54   : > { %s1302_s8 = scalar_lea.vmem %s1301_s9, 256  ;;  %p1303_p2 = scmp.lt.s32.totalorder %s371_s25, %s1301_s9 }
  0x55   : > { %p1298_p10 = pnand %p1296_p6, %p1719_p13  ;;  %p1304_p0 = scmp.lt.s32.totalorder %s1302_s8, %s1295_s14 }
  0x57   : > { %p1299_p4 = pneg %p1298_p10  ;;  %p1305_p8 = por %p1304_p0, %p1303_p2 }
  0x59   : > { %p1306_p11 = pnand %p1305_p8, %p1299_p4 }
  0x5b   : > { %1309 = shalt.err (!%p1306_p11)
}
  0x5c   : > { %1169 = dma.hbm_to_vmem [thread:$0]  (!%p1699_p9), %s1708_s19, 128, %s371_s25, %s1713_s4  }
  0x5d   : > { %s1537_s5 = smov [#allocation13]   ;;  %s1538_s18 = smov [#allocation14]  }
  0x5e   : > { %s311_s16 = sshll.u32 %s1537_s5, 4  ;;  %s324_s24 = sshll.u32 %s1538_s18, 4  ;;  %s312_s16 = int_to_ptr.vmem [resolvable:$true] %s311_s16  ;;  %s325_s24 = int_to_ptr.vmem [resolvable:$true] %s324_s24 }
  0x5f   : > { %s1321_s21 = scalar_lea.vmem %s312_s16, 512  ;;  %p1976_p6 = scmp.ne.s32.totalorder %s1967_s20, 0 }
  0x60   : > { %p1322_p1 = scmp.ne.s32.totalorder %s312_s16, %s1321_s21  ;;  %p1329_p3 = scmp.lt.s32.totalorder %s312_s16, %s312_s16 }
  0x61   : > { %p1977_p12 = pneg %p1976_p6  ;;  %p1330_p4 = scmp.lt.s32.totalorder %s1321_s21, %s1321_s21 }
  0x63   : > { %p1324_p10 = pnand %p1322_p1, %p1977_p12  ;;  %p1331_p8 = por %p1330_p4, %p1329_p3 }
  0x65   : > { %p1325_p5 = pneg %p1324_p10 }
  0x67   : > { %p1332_p11 = pnand %p1331_p8, %p1325_p5 }
  0x69   : > { %1335 = shalt.err (!%p1332_p11)
}
  0x6a   : > { %s1978_s8 = smov 8   ;;  %s1979_s9 = smov 128  }
  0x6b   : > { %1159 = dma.hbm_to_vmem [thread:$0]  (!%p1976_p6), %s1934_s6, 512, %s312_s16, [#allocation12], %s1979_s9, %s1979_s9, %s1978_s8  }
  0x6c   : > { %s1347_s14 = scalar_lea.vmem %s325_s24, 512  ;;  %p1980_p2 = pmov %p1977_p12 }
  0x6d   : > { %p1348_p7 = scmp.ne.s32.totalorder %s325_s24, %s1347_s14  ;;  %p1355_p12 = scmp.lt.s32.totalorder %s325_s24, %s325_s24 }
  0x6e   : > { %p1356_p10 = scmp.lt.s32.totalorder %s1347_s14, %s1347_s14 }
  0x6f   : > { %p1350_p0 = pnand %p1348_p7, %p1980_p2 }
  0x70   : > { %p1357_p5 = por %p1356_p10, %p1355_p12 }
  0x71   : > { %p1351_p1 = pneg %p1350_p0 }
  0x73   : > { %p1358_p3 = pnand %p1357_p5, %p1351_p1 }
  0x75   : > { %1361 = shalt.err (!%p1358_p3)
}
  0x76   : > { %1162 = dma.hbm_to_vmem [thread:$0]  (!%p1976_p6), %s1935_s7, 512, %s325_s24, [#allocation15], %s1979_s9, %s1979_s9, %s1978_s8  }
  0x77   : > { %s1981_s0 = sld [smem:[#allocation28_spill]]  ;;  %s345_s20 = scalar_lea.vmem [#allocation2], %s1694_s22 }
  0x78   : > { %s352_s21 = sshll.u32 %s345_s20, 4  ;;  %s1771_s14 = scalar_lea.hbm %s1930_s2, %s1697_s28  ;;  %s353_s21 = int_to_ptr.vmem [resolvable:$true] %s352_s21 }
  0x79   : > { %s1982_s19 = sand.u32 1, %s1526_s11  }
  0x7a   : > { %s342_s27 = scalar_lea.sflag [#allocation3], %s1982_s19 }
  0x7d   : > { %s1764_s18 = scalar_lea.hbm %s1981_s0, %s1697_s28  ;;  %s1367_s9 = scalar_lea.hbm %s1981_s0, 256 }
  0x7e   : > { %s1362_s1 = scalar_lea.hbm %s1764_s18, 128  ;;  %p1368_p11 = scmp.lt.s32.totalorder %s1764_s18, %s1981_s0 }
  0x7f   : > { %p1363_p6 = scmp.ne.s32.totalorder %s1764_s18, %s1362_s1  ;;  %p1369_p7 = scmp.lt.s32.totalorder %s1367_s9, %s1362_s1 }
  0x81   : > { %p1365_p4 = pnand %p1363_p6, %p1719_p13  ;;  %p1370_p2 = por %p1369_p7, %p1368_p11 }
  0x83   : > { %p1366_p8 = pneg %p1365_p4 }
  0x85   : > { %p1371_p0 = pnand %p1370_p2, %p1366_p8 }
  0x87   : > { %1374 = shalt.err (!%p1371_p0)
}
  0x88   : > { %s1375_s20 = scalar_lea.vmem %s353_s21, 128  ;;  %s1539_s30 = smov [#allocation2]  }
  0x89   : > { %p1376_p1 = scmp.ne.s32.totalorder %s353_s21, %s1375_s20  ;;  %s1380_s25 = sshll.u32 %s1539_s30, 4  ;;  %s1381_s25 = int_to_ptr.vmem [resolvable:$false] %s1380_s25 }
  0x8a   : > { %s1382_s19 = scalar_lea.vmem %s1381_s25, 256  ;;  %p1383_p5 = scmp.lt.s32.totalorder %s353_s21, %s1381_s25 }
  0x8b   : > { %p1378_p12 = pnand %p1376_p1, %p1719_p13  ;;  %p1384_p3 = scmp.lt.s32.totalorder %s1382_s19, %s1375_s20 }
  0x8d   : > { %p1379_p10 = pneg %p1378_p12  ;;  %p1385_p6 = por %p1384_p3, %p1383_p5 }
  0x8f   : > { %p1386_p4 = pnand %p1385_p6, %p1379_p10 }
  0x91   : > { %1389 = shalt.err (!%p1386_p4)
}
  0x92   : > { %1166 = dma.hbm_to_vmem [thread:$0]  (!%p1699_p9), %s1764_s18, 128, %s353_s21, %s342_s27  }
  0x93   : > { %s381_s1 = scalar_lea.vmem [#allocation7], %s1694_s22  ;;  %s1796_s5 = scalar_lea.hbm %s1931_s3, %s1697_s28 }
  0x94   : > { %s388_s24 = sshll.u32 %s381_s1, 4  ;;  %s1390_s16 = scalar_lea.hbm %s1771_s14, 128  ;;  %s389_s24 = int_to_ptr.vmem [resolvable:$true] %s388_s24 }
  0x95   : > { %p1391_p8 = scmp.ne.s32.totalorder %s1771_s14, %s1390_s16  ;;  %s1395_s25 = scalar_lea.hbm %s1930_s2, 256 }
  0x96   : > { %p1396_p2 = scmp.lt.s32.totalorder %s1771_s14, %s1930_s2  ;;  %p1397_p0 = scmp.lt.s32.totalorder %s1395_s25, %s1390_s16 }
  0x97   : > { %p1393_p11 = pnand %p1391_p8, %p1719_p13 }
  0x98   : > { %p1398_p1 = por %p1397_p0, %p1396_p2 }
  0x99   : > { %p1394_p7 = pneg %p1393_p11 }
  0x9b   : > { %p1399_p12 = pnand %p1398_p1, %p1394_p7 }
  0x9d   : > { %1402 = shalt.err (!%p1399_p12)
}
  0x9e   : > { %s1403_s18 = scalar_lea.vmem %s389_s24, 128  ;;  %s1540_s28 = smov [#allocation7]  }
  0x9f   : > { %p1404_p10 = scmp.ne.s32.totalorder %s389_s24, %s1403_s18  ;;  %s1408_s21 = sshll.u32 %s1540_s28, 4  ;;  %s1409_s21 = int_to_ptr.vmem [resolvable:$false] %s1408_s21 }
  0xa0   : > { %s1410_s27 = scalar_lea.vmem %s1409_s21, 256  ;;  %p1411_p6 = scmp.lt.s32.totalorder %s389_s24, %s1409_s21 }
  0xa1   : > { %p1406_p5 = pnand %p1404_p10, %p1719_p13  ;;  %p1412_p4 = scmp.lt.s32.totalorder %s1410_s27, %s1403_s18 }
  0xa3   : > { %p1407_p3 = pneg %p1406_p5  ;;  %p1413_p8 = por %p1412_p4, %p1411_p6 }
  0xa5   : > { %p1414_p11 = pnand %p1413_p8, %p1407_p3 }
  0xa7   : > { %1417 = shalt.err (!%p1414_p11)
}
  0xa8   : > { %1172 = dma.hbm_to_vmem [thread:$0]  (!%p1699_p9), %s1771_s14, 128, %s389_s24, %s1713_s4  }
  0xa9   : > { %s399_s0 = scalar_lea.vmem [#allocation8], %s1694_s22  ;;  %s1983_s8 = sand.u32 1, %s1530_s12  }
  0xaa   : > { %s406_s1 = sshll.u32 %s399_s0, 4  ;;  %s396_s9 = scalar_lea.sflag [#allocation9], %s1983_s8  ;;  %s407_s1 = int_to_ptr.vmem [resolvable:$true] %s406_s1 }
  0xab   : > { %s1418_s16 = scalar_lea.hbm %s1796_s5, 128  ;;  %s1423_s25 = scalar_lea.hbm %s1931_s3, 256 }
  0xac   : > { %p1419_p7 = scmp.ne.s32.totalorder %s1796_s5, %s1418_s16  ;;  %p1424_p1 = scmp.lt.s32.totalorder %s1796_s5, %s1931_s3 }
  0xad   : > { %p1425_p12 = scmp.lt.s32.totalorder %s1423_s25, %s1418_s16 }
  0xae   : > { %p1421_p2 = pnand %p1419_p7, %p1719_p13 }
  0xaf   : > { %p1426_p10 = por %p1425_p12, %p1424_p1 }
  0xb0   : > { %p1422_p0 = pneg %p1421_p2 }
  0xb2   : > { %p1427_p5 = pnand %p1426_p10, %p1422_p0 }
  0xb4   : > { %1430 = shalt.err (!%p1427_p5)
}
  0xb5   : > { %s1431_s4 = scalar_lea.vmem %s407_s1, 128  ;;  %s1541_s22 = smov [#allocation8]  }
  0xb6   : > { %p1432_p3 = scmp.ne.s32.totalorder %s407_s1, %s1431_s4  ;;  %s1436_s14 = sshll.u32 %s1541_s22, 4  ;;  %s1437_s14 = int_to_ptr.vmem [resolvable:$false] %s1436_s14 }
  0xb7   : > { %s1438_s24 = scalar_lea.vmem %s1437_s14, 256  ;;  %p1439_p8 = scmp.lt.s32.totalorder %s407_s1, %s1437_s14 }
  0xb8   : > { %p1434_p6 = pnand %p1432_p3, %p1719_p13  ;;  %p1440_p11 = scmp.lt.s32.totalorder %s1438_s24, %s1431_s4 }
  0xba   : > { %p1435_p4 = pneg %p1434_p6  ;;  %p1441_p7 = por %p1440_p11, %p1439_p8 }
  0xbc   : > { %p1442_p2 = pnand %p1441_p7, %p1435_p4 }
  0xbe   : > { %1445 = shalt.err (!%p1442_p2)
}
  0xbf   : > { %1175 = dma.hbm_to_vmem [thread:$0]  (!%p1699_p9), %s1796_s5, 128, %s407_s1, %s396_s9  }
  0xc0   : > { %p1984_p0 = scmp.ne.s32.totalorder %s1966_s17, 0 }
  0xc1   : > { %s1837_s26 = sand.u32 (!%p1984_p0), 1, %s1522_s10   ;;  %p1985_p13 = scmp.ne.s32.totalorder (!%p1984_p0), %s1963_s15, 0 }
  0xc2   : > { %415 = sbr.rel (%p1984_p0) target bundleno = 448 (0x1c0), region = 56  ;;  %s1840_s28 = sshll.u32 (!%p1984_p0), %s1837_s26, 3 }
  0xc3   : > { %s418_s21 = scalar_lea.sflag (!%p1984_p0), [#allocation3], %s1837_s26  ;;  %s421_s27 = scalar_lea.vmem (!%p1984_p0), [#allocation2], %s1840_s28 }
  0xc7   : > { %1489 = dma.done.wait (%p1985_p13), %s418_s21, 128  }
  0xc8   : > { %1491 = vsyncadd (%p1985_p13), %s418_s21, 4294967168  ;;  %s426_s17 = sand.u32 1, %s1616_s13   ;;  %s430_s5 = scalar_lea.vmem [#allocation5], %s1840_s28 }
  0xc9   : > { %s427_s29 = scalar_lea.sflag [#allocation6], %s426_s17 }
  0xca   : > { %1493 = dma.done.wait (%p1985_p13), %s427_s29, 256  }
  0xcb   : > { %1495 = vsyncadd (%p1985_p13), %s427_s29, 4294967040  ;;  %s439_s0 = scalar_lea.vmem [#allocation7], %s1840_s28  ;;  %s445_s1 = scalar_lea.sflag [#allocation9], %s426_s17 }
  0xcc   : > { %s448_s8 = scalar_lea.vmem [#allocation8], %s1840_s28 }
  0xcd   : > { %1497 = dma.done.wait (%p1985_p13), %s445_s1, 128  }
  0xce   : > { %1499 = vsyncadd (%p1985_p13), %s445_s1, 4294967168  ;;  %p1986_p9 = scmp.eq.s32.totalorder %s1616_s13, 0 }
  0xd0   : > { %1501 = dma.done.wait (%p1986_p9), [#allocation9], 512   ;;  %p1987_p1 = pmov %p1986_p9 }
  0xd2   : > { %1503 = vsyncadd (%p1987_p1), [#allocation9], 4294966784  ;;  %p1988_p12 = pmov %p1987_p1 }
  0xd3   : > { %p1989_p10 = pmov %p1987_p1 }
  0xd4   : > { %1505 = dma.done.wait (%p1988_p12), [#allocation12], 1024  }
  0xd5   : > { %1507 = vsyncadd (%p1989_p10), [#allocation12], 4294966272  ;;  %p1990_p5 = pmov %p1987_p1 }
  0xd6   : > { %p1991_p3 = pmov %p1987_p1 }
  0xd7   : > { %1509 = dma.done.wait (%p1990_p5), [#allocation15], 512  }
  0xd8   : > { %1511 = vsyncadd (%p1991_p3), [#allocation15], 4294966784  ;;  %v1542_v0 = vmov 0.0   ;;  %vm1543_vm0 = vmmov 0   ;;  %v523_v1 = vld [vmem:[#allocation11 + $0x18] sm:$0xff]  ;;  %v522_v3 = vld [vmem:[#allocation11 + $0x10] sm:$0xff] }
  0xd9   : > { %1080 = vmatprep.subr.mxu0 %v1542_v0  ;;  %1091 = vmatprep.subr.mxu1 %v1542_v0  ;;  %v518_v2 = vld [vmem:[#allocation10 + $0x18] sm:$0xff]  ;;  %v517_v4 = vld [vmem:[#allocation10 + $0x10] sm:$0xff]  ;;  %v521_v5 = vld [vmem:[#allocation11 + $0x8] sm:$0xff]  ;;  %vm524_vm1 = vcmask 261120   ;;  %s1992_s16 = sld [smem:[#allocation32_spill]]  ;;  %s1057_s20 = sshll.u32 %s1616_s13, 7 }
  0xda   : > { %1088 = vmatprep.mubr.msk.f32.mxu0 %vm1543_vm0, %v1542_v0  ;;  %1099 = vmatprep.mubr.msk.f32.mxu1 %vm1543_vm0, %v1542_v0  ;;  %v516_v6 = vld [vmem:[#allocation10 + $0x8] sm:$0xff]  ;;  %v520_v7 = vld [vmem:[#allocation11] sm:$0xff]  ;;  %v519_v9 = vld [vmem:[%s430_s5] sm:$0xff]  ;;  %s513_s30 = scalar_lea.vmem [#allocation16], %s1840_s28  ;;  %s1993_s4 = sld [smem:[#allocation33_spill]] }
  0xdb   : > { %1081 = vmatpush3.msra.mxu0 %v523_v1  ;;  %1092 = vmatpush3.msra.mxu1 %v518_v2  ;;  %v515_v8 = vld [vmem:[#allocation10] sm:$0xff]  ;;  %v675_v11 = vld [vmem:[#allocation13 + $0x18] sm:$0xff]  ;;  %v674_v13 = vld [vmem:[#allocation13 + $0x10] sm:$0xff]  ;;  %s852_s25 = sshll.u32 %s513_s30, 4  ;;  %s839_s14 = scalar_lea.sflag [#allocation4], %s1837_s26  ;;  %s853_s25 = int_to_ptr.vmem [resolvable:$true] %s852_s25 }
  0xdc   : > { %1082 = vmatprep.subr.mxu0 %v1542_v0  ;;  %1093 = vmatprep.subr.mxu1 %v1542_v0  ;;  %v514_v10 = vld [vmem:[%s421_s27] sm:$0xff]  ;;  %v754_v12 = vld [vmem:[#allocation14 + $0x18] sm:$0xff]  ;;  %v753_v14 = vld [vmem:[#allocation14 + $0x10] sm:$0xff]  ;;  %s1446_s24 = scalar_lea.vmem %s853_s25, 128  ;;  %p1994_p4 = scmp.ne.s32.totalorder %s1971_s23, 0 }
  0xdd   : > { %1083 = vmatpush3.msra.mxu0 %v522_v3  ;;  %1094 = vmatpush3.msra.mxu1 %v517_v4  ;;  %v673_v15 = vld [vmem:[#allocation13 + $0x8] sm:$0xff]  ;;  %v672_v17 = vld [vmem:[#allocation13] sm:$0xff]  ;;  %v750_v20 = vld [vmem:[%s448_s8] sm:$0xff]  ;;  %p1447_p6 = scmp.ne.s32.totalorder %s853_s25, %s1446_s24  ;;  %s1544_s21 = smov [#allocation16]  }
  0xde   : > { %1084 = vmatprep.subr.mxu0 %v1542_v0  ;;  %1095 = vmatprep.subr.mxu1 %v1542_v0  ;;  %v752_v16 = vld [vmem:[#allocation14 + $0x8] sm:$0xff]  ;;  %v751_v18 = vld [vmem:[#allocation14] sm:$0xff]  ;;  %s1450_s27 = sshll.u32 %s1544_s21, 4  ;;  %s1451_s27 = int_to_ptr.vmem [resolvable:$false] %s1450_s27 }
  0xdf   : > { %1085 = vmatpush3.msra.mxu0 %v521_v5  ;;  %1096 = vmatpush3.msra.mxu1 %v516_v6  ;;  %v671_v19 = vld [vmem:[%s439_s0] sm:$0xff]  ;;  %p1448_p8 = pnand %p1447_p6, %p1994_p4  ;;  %s1452_s13 = scalar_lea.vmem %s1451_s27, 256 }
  0xe0   : > { %1086 = vmatprep.subr.mxu0 %v1542_v0  ;;  %1097 = vmatprep.subr.mxu1 %v1542_v0  ;;  %v1055_v29 = vld [vmem:[%s1992_s16] ss:$0 sm:$0xff]  ;;  %s850_s22 = scalar_lea.hbm %s1993_s4, %s1057_s20  ;;  %p1453_p7 = scmp.lt.s32.totalorder %s853_s25, %s1451_s27 }
  0xe1   : > { %1087 = vmatpush3.msra.mxu0 %v520_v7  ;;  %1098 = vmatpush3.msra.mxu1 %v515_v8  ;;  %p1449_p11 = pneg %p1448_p8  ;;  %p1454_p2 = scmp.lt.s32.totalorder %s1452_s13, %s1446_s24 }
  0xe2   : > { %1089 = vmatmul.mubr.msk.f32.vlgmr.msra.gmra.mxu0 %vm524_vm1, %v519_v9  ;;  %1102 = vmatprep.subr.mxu0 %v1542_v0 }
  0xe3   : > { %1113 = vmatprep.subr.mxu1 %v1542_v0  ;;  %1100 = vmatmul.mubr.msk.f32.vlgmr.msra.gmra.mxu1 %vm524_vm1, %v514_v10  ;;  %p1455_p0 = por %p1454_p2, %p1453_p7 }
  0xe4   : > { %1103 = vmatpush3.msra.mxu0 %v675_v11  ;;  %1114 = vmatpush3.msra.mxu1 %v754_v12 }
  0xe5   : > { %1104 = vmatprep.subr.mxu0 %v1542_v0  ;;  %1115 = vmatprep.subr.mxu1 %v1542_v0  ;;  %p1456_p13 = pnand %p1455_p0, %p1449_p11 }
  0xe6   : > { %1105 = vmatpush3.msra.mxu0 %v674_v13  ;;  %1116 = vmatpush3.msra.mxu1 %v753_v14 }
  0xe7   : > { %1106 = vmatprep.subr.mxu0 %v1542_v0  ;;  %1117 = vmatprep.subr.mxu1 %v1542_v0 }
  0xe8   : > { %1107 = vmatpush3.msra.mxu0 %v673_v15  ;;  %1118 = vmatpush3.msra.mxu1 %v752_v16 }
  0xe9   : > { %1108 = vmatprep.subr.mxu0 %v1542_v0  ;;  %1119 = vmatprep.subr.mxu1 %v1542_v0 }
  0xea   : > { %1109 = vmatpush3.msra.mxu0 %v672_v17  ;;  %1110 = vmatprep.mubr.msk.f32.mxu0 %vm1543_vm0, %v1542_v0 }
  0xeb   : > { %1120 = vmatpush3.msra.mxu1 %v751_v18  ;;  %1121 = vmatprep.mubr.msk.f32.mxu1 %vm1543_vm0, %v1542_v0 }
  0xec   : > { %1111 = vmatmul.mubr.msk.f32.vlgmr.msra.gmra.mxu0 %vm524_vm1, %v671_v19  ;;  %1122 = vmatmul.mubr.msk.f32.vlgmr.msra.gmra.mxu1 %vm524_vm1, %v750_v20 }
 0x1a2   : > { %v594_v21 = vpop.f32.mrf.mxu0 }
 0x1a3   : > { %v667_v22 = vpop.f32.mrf.mxu1 }
 0x1a4   : > { %v1090_v23 = vpop.f32.mrf.mxu0  ;;  %v668_v25 = vadd.f32 %v667_v22, %v594_v21 }
 0x1a5   : > { %v1101_v24 = vpop.f32.mrf.mxu1 }
 0x1ac   : > { %v745_v26 = vpop.f32.mrf.mxu0  ;;  %v824_v27 = vpop.f32.mrf.mxu1 }
 0x1ad   : > { %v749_v28 = vadd.f32 %v745_v26, %v668_v25 }
 0x1ae   : > { %v1112_v30 = vpop.f32.mrf.mxu0  ;;  %v1123_v31 = vpop.f32.mrf.mxu1 }
 0x1af   : > { %v828_v32 = vadd.f32 %v824_v27, %v749_v28 }
 0x1b1   : > { %v836_v33 = vadd.f32 %v1055_v29, %v828_v32 }
 0x1b3   : > { %837 = vst.msk [vmem:[%s513_s30] sm:$0xff] %vm524_vm1, %v836_v33 }
 0x1b4   : > { %1459 = shalt.err (!%p1456_p13)
}
 0x1b5   : > { %s1460_s28 = scalar_lea.hbm %s850_s22, 128  ;;  %s1464_s29 = scalar_lea.hbm %s1993_s4, 256 }
 0x1b6   : > { %p1461_p9 = scmp.ne.s32.totalorder %s850_s22, %s1460_s28  ;;  %p1465_p10 = scmp.lt.s32.totalorder %s850_s22, %s1993_s4 }
 0x1b7   : > { %p1466_p5 = scmp.lt.s32.totalorder %s1464_s29, %s1460_s28 }
 0x1b8   : > { %p1462_p1 = pnand %p1461_p9, %p1994_p4 }
 0x1b9   : > { %p1467_p3 = por %p1466_p5, %p1465_p10 }
 0x1ba   : > { %p1463_p12 = pneg %p1462_p1 }
 0x1bc   : > { %p1468_p6 = pnand %p1467_p3, %p1463_p12 }
 0x1be   : > { %1471 = shalt.err (!%p1468_p6)
}
 0x1bf   : > { %1148 = dma.vmem_to_hbm [thread:$0]  (%p1994_p4), %s853_s25, 128, %s850_s22, %s839_s14  }
 0x1c0 PF: > { %s1995_s1 = sld [smem:[#allocation24_spill]]  ;;  %p1998_p11 = scmp.ge.s32.totalorder %s1530_s12, 2 }
 0x1c1   : > { %s1996_s8 = sld [smem:[#allocation25_spill]] }
 0x1c6   : > { %s864_s15 = sand.u32 1, %s1995_s1  }
 0x1c7   : > { %p1997_p8 = scmp.ne.s32.totalorder %s1996_s8, 0  ;;  %s865_s9 = scalar_lea.sflag [#allocation4], %s864_s15 }
 0x1c9   : > { %p1177_p7 = pnand %p1998_p11, %p1997_p8 }
 0x1cb   : > { %p1178_p2 = pneg %p1177_p7 }
 0x1cd   : > { %1513 = dma.done.wait (%p1178_p2), %s865_s9, 128  }
 0x1ce   : > { %1515 = vsyncadd (%p1178_p2), %s865_s9, 4294967168  ;;  %s1999_s12 = sld [smem:[#allocation26_spill]]  ;;  %s2001_s30 = smov %s1522_s10 }
 0x1cf   : > { %s2000_s16 = sld [smem:[#allocation27_spill]]  ;;  %s2002_s10 = smov %s1526_s11 }
 0x1d4   : > { %p30_p0 = scmp.ge.s32.totalorder %s1999_s12, 4  }
 0x1d5   : > { %s2003_s11 = smov %s2000_s16 }
 0x1d6   :  { %32 = sbr.rel (!%p30_p0) target bundleno = 18 (0x12), region = 154 }
 0x1db   :  { %870 = vsyncpa [#allocation3], 1 }
 0x1dc   :  { %872 = vsyncpa [#allocation3 + $0x1], 1 }
 0x1dd   :  { %873 = vsyncpa [#allocation6], 1 }
 0x1de   :  { %875 = vsyncpa [#allocation6 + $0x1], 1 }
 0x1df   :  { %876 = vsyncpa [#allocation9], 1 }
 0x1e0   :  { %878 = vsyncpa [#allocation9 + $0x1], 1 }
 0x1e1   :  { %879 = vsyncpa [#allocation12], 1 }
 0x1e2   :  { %880 = vsyncpa [#allocation15], 1 }
 0x1e3   :  { %881 = vsyncpa [#allocation4], 1 }
 0x1e4   :  { %883 = vsyncpa [#allocation4 + $0x1], 1 }

</bundles_post_ra>
